<compile_context>
chip_gen: v7x
topology: tpu7x:2x2x1
jax: 0.10.0
libtpu: 0.0.40
codegen_flags: <defaults>
</compile_context>

<pallas_src>
import jax
import jax.numpy as jnp
from jax import lax
from jax.experimental import pallas as pl
from jax.experimental.pallas import tpu as pltpu

# ---- config (ViTConfig analogue, small synthetic sizes) ---------------------
NUM_HIDDEN_LAYERS = 12
NUM_EMBEDDINGS = NUM_HIDDEN_LAYERS - 2      # 10
HIDDEN_SIZE = 128
BATCH = 8
LN_EPS = 1e-5


def _time_embed_kernel(time_ref, table_ref, gb_ref, out_ref, x_scratch):
    """Gather rows of the Linear-fused table by SMEM index, then LayerNorm."""
    B = out_ref.shape[0]
    NE = table_ref.shape[0]

    # ---- embedding (+ folded Linear) lookup: direct row reads, no MXU ----
    for i in range(B):                               # B small & static -> fully unrolled
        t = time_ref[i]                              # scalar read from SMEM
        t = jnp.minimum(jnp.maximum(t, 0), NE - 1)   # guard OOB (semantic divergence doc'd above)
        x_scratch[i:i + 1, :] = table_ref[pl.ds(t, 1), :]

    # ---- LayerNorm over the hidden axis (vectorized across the batch) ----
    x = x_scratch[...]                               # (B, H) f32, exactly one vreg at B=8,H=128
    mean = jnp.mean(x, axis=-1, keepdims=True)
    var = jnp.mean((x - mean) ** 2, axis=-1, keepdims=True)
    xn = (x - mean) * lax.rsqrt(var + LN_EPS)
    out_ref[...] = (xn * gb_ref[0:1, :] + gb_ref[1:2, :]).astype(out_ref.dtype)


def vit_time_embedding(time, emb_table, w, b, gamma, beta):
    """time: (B,) int -> (B, H) float32.  Matches nn.Embedding -> nn.Linear -> nn.LayerNorm."""
    B = time.shape[0]
    H = emb_table.shape[1]

    # Fold the Linear into the table:  (E @ W^T + b)[t] == E[t] @ W^T + b.
    # dot_general contracts w's `in` axis directly -> no materialized w.T.
    # Under jit with static weights this constant-folds to a (NE, H) table.
    fused_table = lax.dot_general(
        emb_table, w,
        dimension_numbers=(((1,), (1,)), ((), ())),
        preferred_element_type=jnp.float32,
    ) + b[None, :]                                    # (NE, H)

    # Pack the remaining 1xH params into a single (2, H) operand -> one DMA.
    gb = jnp.stack([gamma, beta], axis=0)

    smem = pl.BlockSpec(memory_space=pltpu.MemorySpace.SMEM)
    vmem = pl.BlockSpec(memory_space=pltpu.MemorySpace.VMEM)
    return pl.pallas_call(
        _time_embed_kernel,
        out_shape=jax.ShapeDtypeStruct((B, H), jnp.float32),
        in_specs=[smem, vmem, vmem],
        out_specs=vmem,
        scratch_shapes=[pltpu.VMEM((B, H), jnp.float32)],
    )(time.astype(jnp.int32), fused_table, gb)


def _reference(time, emb_table, w, b, gamma, beta):
    x = emb_table[time]                       # embedding lookup
    x = x @ w.T + b                           # nn.Linear
    mean = jnp.mean(x, axis=-1, keepdims=True)
    var = jnp.mean((x - mean) ** 2, axis=-1, keepdims=True)
    xn = (x - mean) / jnp.sqrt(var + LN_EPS)
    return xn * gamma + beta


if __name__ == "__main__":
    key = jax.random.PRNGKey(0)
    k_t, k_e, k_w, k_b = jax.random.split(key, 4)

    # Deterministic synthetic parameters (shapes from the module's __init__).
    emb_table = jax.random.normal(k_e, (NUM_EMBEDDINGS, HIDDEN_SIZE), jnp.float32)
    w = jax.random.normal(k_w, (HIDDEN_SIZE, HIDDEN_SIZE), jnp.float32) * (
        1.0 / jnp.sqrt(HIDDEN_SIZE)
    )
    b = jax.random.normal(k_b, (HIDDEN_SIZE,), jnp.float32) * 0.01
    gamma = jnp.ones((HIDDEN_SIZE,), jnp.float32)
    beta = jnp.zeros((HIDDEN_SIZE,), jnp.float32)

    # Example input: integer layer/time indices.
    time = jax.random.randint(k_t, (BATCH,), 0, NUM_EMBEDDINGS, dtype=jnp.int32)

    out = vit_time_embedding(time, emb_table, w, b, gamma, beta)
    out = jax.block_until_ready(out)

    ref = _reference(time, emb_table, w, b, gamma, beta)
    assert out.shape == (BATCH, HIDDEN_SIZE)
    assert jnp.allclose(out, ref, atol=1e-4, rtol=1e-4), "mismatch vs reference"

    print("KERNEL_OK")
</pallas_src>

<mosaic_0001>
module attributes {stable_mosaic.version = 11 : i64} {
  func.func @_time_embed_kernel(%arg0: memref<8xi32, #tpu.memory_space<smem>>, %arg1: memref<10x128xf32, #tpu.memory_space<vmem>>, %arg2: memref<2x128xf32, #tpu.memory_space<vmem>>, %arg3: memref<8x128xf32, #tpu.memory_space<vmem>>, %arg4: memref<8x128xf32, #tpu.memory_space<vmem>>) attributes {dimension_semantics = [], scalar_prefetch = 0 : i64, scratch_operands = 1 : i64, tpu.core_type = #tpu.core_type<tc>} {
    %c0 = arith.constant 0 : index
    %0 = memref.load %arg0[%c0] : memref<8xi32, #tpu.memory_space<smem>>
    %c0_i32 = arith.constant 0 : i32
    %1 = arith.maxsi %0, %c0_i32 : i32
    %c9_i32 = arith.constant 9 : i32
    %2 = arith.minsi %1, %c9_i32 : i32
    %3 = arith.index_cast %2 : i32 to index
    %c0_0 = arith.constant 0 : index
    %4 = vector.load %arg1[%3, %c0_0] : memref<10x128xf32, #tpu.memory_space<vmem>>, vector<1x128xf32>
    %c0_1 = arith.constant 0 : index
    %c0_2 = arith.constant 0 : index
    %5 = vector.load %arg4[%c0_1, %c0_2] : memref<8x128xf32, #tpu.memory_space<vmem>>, vector<1x128xf32>
    tpu.vector_store %arg4[%c0_1, %c0_2], %4 {strides = array<i32>} : memref<8x128xf32, #tpu.memory_space<vmem>>, vector<1x128xf32>,
    %c1 = arith.constant 1 : index
    %6 = memref.load %arg0[%c1] : memref<8xi32, #tpu.memory_space<smem>>
    %c0_i32_3 = arith.constant 0 : i32
    %7 = arith.maxsi %6, %c0_i32_3 : i32
    %c9_i32_4 = arith.constant 9 : i32
    %8 = arith.minsi %7, %c9_i32_4 : i32
    %9 = arith.index_cast %8 : i32 to index
    %c0_5 = arith.constant 0 : index
    %10 = vector.load %arg1[%9, %c0_5] : memref<10x128xf32, #tpu.memory_space<vmem>>, vector<1x128xf32>
    %c1_6 = arith.constant 1 : index
    %c0_7 = arith.constant 0 : index
    %11 = vector.load %arg4[%c1_6, %c0_7] : memref<8x128xf32, #tpu.memory_space<vmem>>, vector<1x128xf32>
    tpu.vector_store %arg4[%c1_6, %c0_7], %10 {strides = array<i32>} : memref<8x128xf32, #tpu.memory_space<vmem>>, vector<1x128xf32>,
    %c2 = arith.constant 2 : index
    %12 = memref.load %arg0[%c2] : memref<8xi32, #tpu.memory_space<smem>>
    %c0_i32_8 = arith.constant 0 : i32
    %13 = arith.maxsi %12, %c0_i32_8 : i32
    %c9_i32_9 = arith.constant 9 : i32
    %14 = arith.minsi %13, %c9_i32_9 : i32
    %15 = arith.index_cast %14 : i32 to index
    %c0_10 = arith.constant 0 : index
    %16 = vector.load %arg1[%15, %c0_10] : memref<10x128xf32, #tpu.memory_space<vmem>>, vector<1x128xf32>
    %c2_11 = arith.constant 2 : index
    %c0_12 = arith.constant 0 : index
    %17 = vector.load %arg4[%c2_11, %c0_12] : memref<8x128xf32, #tpu.memory_space<vmem>>, vector<1x128xf32>
    tpu.vector_store %arg4[%c2_11, %c0_12], %16 {strides = array<i32>} : memref<8x128xf32, #tpu.memory_space<vmem>>, vector<1x128xf32>,
    %c3 = arith.constant 3 : index
    %18 = memref.load %arg0[%c3] : memref<8xi32, #tpu.memory_space<smem>>
    %c0_i32_13 = arith.constant 0 : i32
    %19 = arith.maxsi %18, %c0_i32_13 : i32
    %c9_i32_14 = arith.constant 9 : i32
    %20 = arith.minsi %19, %c9_i32_14 : i32
    %21 = arith.index_cast %20 : i32 to index
    %c0_15 = arith.constant 0 : index
    %22 = vector.load %arg1[%21, %c0_15] : memref<10x128xf32, #tpu.memory_space<vmem>>, vector<1x128xf32>
    %c3_16 = arith.constant 3 : index
    %c0_17 = arith.constant 0 : index
    %23 = vector.load %arg4[%c3_16, %c0_17] : memref<8x128xf32, #tpu.memory_space<vmem>>, vector<1x128xf32>
    tpu.vector_store %arg4[%c3_16, %c0_17], %22 {strides = array<i32>} : memref<8x128xf32, #tpu.memory_space<vmem>>, vector<1x128xf32>,
    %c4 = arith.constant 4 : index
    %24 = memref.load %arg0[%c4] : memref<8xi32, #tpu.memory_space<smem>>
    %c0_i32_18 = arith.constant 0 : i32
    %25 = arith.maxsi %24, %c0_i32_18 : i32
    %c9_i32_19 = arith.constant 9 : i32
    %26 = arith.minsi %25, %c9_i32_19 : i32
    %27 = arith.index_cast %26 : i32 to index
    %c0_20 = arith.constant 0 : index
    %28 = vector.load %arg1[%27, %c0_20] : memref<10x128xf32, #tpu.memory_space<vmem>>, vector<1x128xf32>
    %c4_21 = arith.constant 4 : index
    %c0_22 = arith.constant 0 : index
    %29 = vector.load %arg4[%c4_21, %c0_22] : memref<8x128xf32, #tpu.memory_space<vmem>>, vector<1x128xf32>
    tpu.vector_store %arg4[%c4_21, %c0_22], %28 {strides = array<i32>} : memref<8x128xf32, #tpu.memory_space<vmem>>, vector<1x128xf32>,
    %c5 = arith.constant 5 : index
    %30 = memref.load %arg0[%c5] : memref<8xi32, #tpu.memory_space<smem>>
    %c0_i32_23 = arith.constant 0 : i32
    %31 = arith.maxsi %30, %c0_i32_23 : i32
    %c9_i32_24 = arith.constant 9 : i32
    %32 = arith.minsi %31, %c9_i32_24 : i32
    %33 = arith.index_cast %32 : i32 to index
    %c0_25 = arith.constant 0 : index
    %34 = vector.load %arg1[%33, %c0_25] : memref<10x128xf32, #tpu.memory_space<vmem>>, vector<1x128xf32>
    %c5_26 = arith.constant 5 : index
    %c0_27 = arith.constant 0 : index
    %35 = vector.load %arg4[%c5_26, %c0_27] : memref<8x128xf32, #tpu.memory_space<vmem>>, vector<1x128xf32>
    tpu.vector_store %arg4[%c5_26, %c0_27], %34 {strides = array<i32>} : memref<8x128xf32, #tpu.memory_space<vmem>>, vector<1x128xf32>,
    %c6 = arith.constant 6 : index
    %36 = memref.load %arg0[%c6] : memref<8xi32, #tpu.memory_space<smem>>
    %c0_i32_28 = arith.constant 0 : i32
    %37 = arith.maxsi %36, %c0_i32_28 : i32
    %c9_i32_29 = arith.constant 9 : i32
    %38 = arith.minsi %37, %c9_i32_29 : i32
    %39 = arith.index_cast %38 : i32 to index
    %c0_30 = arith.constant 0 : index
    %40 = vector.load %arg1[%39, %c0_30] : memref<10x128xf32, #tpu.memory_space<vmem>>, vector<1x128xf32>
    %c6_31 = arith.constant 6 : index
    %c0_32 = arith.constant 0 : index
    %41 = vector.load %arg4[%c6_31, %c0_32] : memref<8x128xf32, #tpu.memory_space<vmem>>, vector<1x128xf32>
    tpu.vector_store %arg4[%c6_31, %c0_32], %40 {strides = array<i32>} : memref<8x128xf32, #tpu.memory_space<vmem>>, vector<1x128xf32>,
    %c7 = arith.constant 7 : index
    %42 = memref.load %arg0[%c7] : memref<8xi32, #tpu.memory_space<smem>>
    %c0_i32_33 = arith.constant 0 : i32
    %43 = arith.maxsi %42, %c0_i32_33 : i32
    %c9_i32_34 = arith.constant 9 : i32
    %44 = arith.minsi %43, %c9_i32_34 : i32
    %45 = arith.index_cast %44 : i32 to index
    %c0_35 = arith.constant 0 : index
    %46 = vector.load %arg1[%45, %c0_35] : memref<10x128xf32, #tpu.memory_space<vmem>>, vector<1x128xf32>
    %c7_36 = arith.constant 7 : index
    %c0_37 = arith.constant 0 : index
    %47 = vector.load %arg4[%c7_36, %c0_37] : memref<8x128xf32, #tpu.memory_space<vmem>>, vector<1x128xf32>
    tpu.vector_store %arg4[%c7_36, %c0_37], %46 {strides = array<i32>} : memref<8x128xf32, #tpu.memory_space<vmem>>, vector<1x128xf32>,
    %c0_38 = arith.constant 0 : index
    %c0_39 = arith.constant 0 : index
    %48 = vector.load %arg4[%c0_38, %c0_39] : memref<8x128xf32, #tpu.memory_space<vmem>>, vector<8x128xf32>
    %cst = arith.constant dense<0.000000e+00> : vector<8xf32>
    %49 = vector.multi_reduction <add>, %48, %cst [1] : vector<8x128xf32> to vector<8xf32>
    %50 = vector.shape_cast %49 : vector<8xf32> to vector<8x1xf32>
    %cst_40 = arith.constant 1.280000e+02 : f32
    %51 = vector.broadcast %cst_40 : f32 to vector<8x1xf32>
    %52 = arith.divf %50, %51 : vector<8x1xf32>
    %53 = vector.broadcast %52 : vector<8x1xf32> to vector<8x128xf32>
    %54 = arith.subf %48, %53 : vector<8x128xf32>
    %55 = arith.mulf %54, %54 : vector<8x128xf32>
    %cst_41 = arith.constant dense<0.000000e+00> : vector<8xf32>
    %56 = vector.multi_reduction <add>, %55, %cst_41 [1] : vector<8x128xf32> to vector<8xf32>
    %57 = vector.shape_cast %56 : vector<8xf32> to vector<8x1xf32>
    %cst_42 = arith.constant 1.280000e+02 : f32
    %58 = vector.broadcast %cst_42 : f32 to vector<8x1xf32>
    %59 = arith.divf %57, %58 : vector<8x1xf32>
    %60 = vector.broadcast %52 : vector<8x1xf32> to vector<8x128xf32>
    %61 = arith.subf %48, %60 : vector<8x128xf32>
    %cst_43 = arith.constant 9.99999974E-6 : f32
    %62 = vector.broadcast %cst_43 : f32 to vector<8x1xf32>
    %63 = arith.addf %59, %62 : vector<8x1xf32>
    %64 = math.rsqrt %63 : vector<8x1xf32>
    %65 = vector.broadcast %64 : vector<8x1xf32> to vector<8x128xf32>
    %66 = arith.mulf %61, %65 : vector<8x128xf32>
    %c0_44 = arith.constant 0 : index
    %c0_45 = arith.constant 0 : index
    %67 = vector.load %arg2[%c0_44, %c0_45] : memref<2x128xf32, #tpu.memory_space<vmem>>, vector<1x128xf32>
    %68 = vector.broadcast %67 : vector<1x128xf32> to vector<8x128xf32>
    %69 = arith.mulf %66, %68 : vector<8x128xf32>
    %c1_46 = arith.constant 1 : index
    %c0_47 = arith.constant 0 : index
    %70 = vector.load %arg2[%c1_46, %c0_47] : memref<2x128xf32, #tpu.memory_space<vmem>>, vector<1x128xf32>
    %71 = vector.broadcast %70 : vector<1x128xf32> to vector<8x128xf32>
    %72 = arith.addf %69, %71 : vector<8x128xf32>
    %c0_48 = arith.constant 0 : index
    %c0_49 = arith.constant 0 : index
    %73 = vector.load %arg3[%c0_48, %c0_49] : memref<8x128xf32, #tpu.memory_space<vmem>>, vector<8x128xf32>
    tpu.vector_store %arg3[%c0_48, %c0_49], %72 {strides = array<i32>} : memref<8x128xf32, #tpu.memory_space<vmem>>, vector<8x128xf32>,
    return
  }
}

</mosaic_0001>

<bundles_post_ra>
// kernel: tpu_custom_call.1
= control target key start
LH: loop header
LB: loop body
LE: loop exit
PB: predicated region body
PF: predicated region fallthrough
CT: control target
= control target key end

     0   :  { %8 = vsyncpa [#allocation6], 0  ;;  %s378_s0 = inlined_call_operand.hbm [shape: s32[8], index: 0, kind: input, shape index: {}]   ;;  %s379_s1 = inlined_call_operand.hbm [shape: f32[10,128], index: 1, kind: input, shape index: {}]   ;;  %s380_s2 = inlined_call_operand.vmem [shape: f32[2,128], index: 2, kind: input, shape index: {}]   ;;  %s381_s3 = inlined_call_operand.hbm [shape: f32[8,128], index: 3, kind: output, shape index: {}]  }
   0x1   :  { %9 = vsyncpa [#allocation4], 0 }
   0x2   :  { %10 = vsyncpa [#allocation5], 0  ;;  %s226_s14 = scalar_lea.hbm %s378_s0, 16 }
   0x3   :  { %p227_p0 = scmp.ne.s32.totalorder %s378_s0, %s226_s14  ;;  %p230_p1 = scmp.lt.u32.totalorder %s226_s14, %s378_s0 }
   0x5   :  { %p232_p2 = pnand %p230_p1, %p227_p0 }
   0x7   :  { %235 = shalt.err (!%p232_p2)
}
   0x8   :  { %s286_s19 = smov [#allocation3]   ;;  %s287_s22 = smov [#allocation7]  }
   0x9   :  { %18 = dma.hbm_to_smem %s378_s0, 16, %s286_s19, [#allocation6]  }
   0xa   :  { %s24_s23 = sshll.u32 %s287_s22, 4  ;;  %s236_s26 = scalar_lea.hbm %s379_s1, 256  ;;  %s25_s23 = int_to_ptr.vmem [resolvable:$true] %s24_s23 }
   0xb   :  { %p237_p3 = scmp.ne.s32.totalorder %s379_s1, %s236_s26  ;;  %p240_p4 = scmp.lt.u32.totalorder %s236_s26, %s379_s1 }
   0xd   :  { %p242_p5 = pnand %p240_p4, %p237_p3 }
   0xf   :  { %245 = shalt.err (!%p242_p5)
}
  0x10   :  { %s246_s4 = scalar_lea.vmem %s25_s23, 256  ;;  %p251_p7 = scmp.lt.s32.totalorder %s25_s23, %s25_s23 }
  0x11   :  { %p247_p6 = scmp.ne.s32.totalorder %s25_s23, %s246_s4  ;;  %p252_p8 = scmp.lt.s32.totalorder %s246_s4, %s246_s4 }
  0x13   :  { %p253_p9 = por %p252_p8, %p251_p7 }
  0x15   :  { %p254_p10 = pnand %p253_p9, %p247_p6 }
  0x17   :  { %257 = shalt.err (!%p254_p10)
}
  0x18   :  { %s288_s0 = smov 128   ;;  %s289_s5 = smov 8  }
  0x19   :  { %30 = dma.hbm_to_vmem [thread:$0]  %s379_s1, 256, %s25_s23, [#allocation4], %s288_s0, %s288_s0, %s289_s5  }
  0x1a   :  { %280 = dma.done.wait [#allocation6], 16  }
  0x1b   :  { %281 = vsyncadd [#allocation6], 4294967280 }
  0x1c   :  { %282 = dma.done.wait [#allocation4], 256  }
  0x1d   :  { %283 = vsyncadd [#allocation4], 4294967040 }
  0x1e   :  { %39 = sfence }
  0x1f   :  { %s40_s8 = sld [smem:[#allocation3]]  ;;  %s159_s9 = sld [smem:[#allocation3 + $0x1]]  ;;  %v201_v17 = vld [vmem:[%s380_s2] ss:$0 sm:$0xff]  ;;  %v202_v19 = vld [vmem:[%s380_s2 + $0x1] ss:$0 sm:$0xff] }
  0x20   :  { %s165_s10 = sld [smem:[#allocation3 + $0x2]]  ;;  %s335_s11 = sld [smem:[#allocation3 + $0x3]] }
  0x21   :  { %s337_s12 = sld [smem:[#allocation3 + $0x4]]  ;;  %s339_s13 = sld [smem:[#allocation3 + $0x5]] }
  0x22   :  { %s341_s14 = sld [smem:[#allocation3 + $0x6]]  ;;  %s343_s15 = sld [smem:[#allocation3 + $0x7]] }
  0x23   :  { %s290_s29 = smov [#allocation8]  }
  0x24   :  { %s136_s30 = sshll.u32 %s290_s29, 4  ;;  %s137_s30 = int_to_ptr.vmem [resolvable:$true] %s136_s30 }
  0x25   :  { %p41_p11 = scmp.gt.s32.totalorder %s40_s8, 0  ;;  %p154_p12 = scmp.lt.s32.totalorder %s40_s8, 9 }
  0x26   :  { %p49_p13 = scmp.gt.s32.totalorder %s159_s9, 0  ;;  %p160_p0 = scmp.lt.s32.totalorder %s159_s9, 9 }
  0x27   :  { %s383_s8 = smov (!%p41_p11, %s40_s8), 0  ;;  %p57_p1 = scmp.gt.s32.totalorder %s165_s10, 0 }
  0x28   :  { %s385_s9 = smov (!%p49_p13, %s159_s9), 0  ;;  %s387_s8 = smov (!%p154_p12, %s383_s8), 9 }
  0x29   :  { %s389_s9 = smov (!%p160_p0, %s385_s9), 9  ;;  %s45_s1 = scalar_lea.vmem [#allocation7], %s387_s8 }
  0x2a   :  { %v46_v0 = vld [vmem:[%s45_s1] sm:$0x1]  ;;  %p166_p2 = scmp.lt.s32.totalorder %s165_s10, 9  ;;  %s53_s16 = scalar_lea.vmem [#allocation7], %s389_s9 }
  0x2b   :  { %47 = vst [vmem:[#allocation2] sm:$0x1] %v46_v0  ;;  %v54_v1 = vld [vmem:[%s53_s16] sm:$0x1]  ;;  %s391_s10 = smov (!%p57_p1, %s165_s10), 0  ;;  %p65_p3 = scmp.gt.s32.totalorder %s335_s11, 0 }
  0x2c   :  { %55 = vst [vmem:[#allocation2 + $0x1] sm:$0x1] %v54_v1  ;;  %p172_p4 = scmp.lt.s32.totalorder %s335_s11, 9  ;;  %s393_s10 = smov (!%p166_p2, %s391_s10), 9 }
  0x2d   :  { %s395_s11 = smov (!%p65_p3, %s335_s11), 0  ;;  %p73_p5 = scmp.gt.s32.totalorder %s337_s12, 0 }
  0x2e   :  { %s61_s17 = scalar_lea.vmem [#allocation7], %s393_s10  ;;  %s397_s11 = smov (!%p172_p4, %s395_s11), 9 }
  0x2f   :  { %v62_v2 = vld [vmem:[%s61_s17] sm:$0x1]  ;;  %s74_s18 = scalar_select %p73_p5, %s337_s12, 0 }
  0x30   :  { %63 = vst [vmem:[#allocation2 + $0x2] sm:$0x1] %v62_v2  ;;  %p178_p6 = scmp.lt.s32.totalorder %s337_s12, 9  ;;  %s69_s19 = scalar_lea.vmem [#allocation7], %s397_s11 }
  0x31   :  { %v70_v3 = vld [vmem:[%s69_s19] sm:$0x1]  ;;  %p81_p7 = scmp.gt.s32.totalorder %s339_s13, 0  ;;  %p184_p8 = scmp.lt.s32.totalorder %s339_s13, 9 }
  0x32   :  { %71 = vst [vmem:[#allocation2 + $0x3] sm:$0x1] %v70_v3  ;;  %s399_s18 = smov (!%p178_p6, %s74_s18), 9  ;;  %p89_p9 = scmp.gt.s32.totalorder %s341_s14, 0 }
  0x33   :  { %s401_s13 = smov (!%p81_p7, %s339_s13), 0  ;;  %s77_s20 = scalar_lea.vmem [#allocation7], %s399_s18 }
  0x34   :  { %v78_v4 = vld [vmem:[%s77_s20] sm:$0x1]  ;;  %s403_s13 = smov (!%p184_p8, %s401_s13), 9  ;;  %p190_p10 = scmp.lt.s32.totalorder %s341_s14, 9 }
  0x35   :  { %79 = vst [vmem:[#allocation2 + $0x4] sm:$0x1] %v78_v4  ;;  %s90_s21 = scalar_select %p89_p9, %s341_s14, 0 }
  0x36   :  { %s85_s22 = scalar_lea.vmem [#allocation7], %s403_s13  ;;  %p97_p11 = scmp.gt.s32.totalorder %s343_s15, 0 }
  0x37   :  { %v86_v5 = vld [vmem:[%s85_s22] sm:$0x1]  ;;  %p196_p12 = scmp.lt.s32.totalorder %s343_s15, 9  ;;  %s405_s21 = smov (!%p190_p10, %s90_s21), 9 }
  0x38   :  { %87 = vst [vmem:[#allocation2 + $0x5] sm:$0x1] %v86_v5  ;;  %s407_s15 = smov (!%p97_p11, %s343_s15), 0  ;;  %s93_s23 = scalar_lea.vmem [#allocation7], %s405_s21 }
  0x39   :  { %v94_v6 = vld [vmem:[%s93_s23] sm:$0x1]  ;;  %s409_s15 = smov (!%p196_p12, %s407_s15), 9  ;;  %s258_s4 = scalar_lea.vmem %s137_s30, 128 }
  0x3a   :  { %95 = vst [vmem:[#allocation2 + $0x6] sm:$0x1] %v94_v6  ;;  %s101_s24 = scalar_lea.vmem [#allocation7], %s409_s15  ;;  %p259_p13 = scmp.ne.s32.totalorder %s137_s30, %s258_s4 }
  0x3b   :  { %v102_v7 = vld [vmem:[%s101_s24] sm:$0x1]  ;;  %p263_p0 = scmp.lt.s32.totalorder %s137_s30, %s137_s30  ;;  %p264_p1 = scmp.lt.s32.totalorder %s258_s4, %s258_s4 }
  0x3c   :  { %103 = vst [vmem:[#allocation2 + $0x7] sm:$0x1] %v102_v7 }
  0x3d   :  { %p265_p2 = por %p264_p1, %p263_p0 }
  0x3f   :  { %p266_p3 = pnand %p265_p2, %p259_p13 }
  0x43   :  { %v104_v8 = vld [vmem:[#allocation2] sm:$0xff] }
  0x44   :  { %105 = vadd.xlane.f32.xlu0 %v104_v8 }
  0xd1   :  { %v106_v9 = vpop.xlane.xlu0 %105 }
  0xd2   :  { %v108_v10 = vmul.f32 0.0078125, %v106_v9 }
  0xd4   :  { %v109_v11 = vsub.f32 %v104_v8, %v108_v10 }
  0xd6   :  { %v110_v12 = vmul.f32 %v109_v11, %v109_v11 }
  0xd8   :  { %111 = vadd.xlane.f32.xlu0 %v110_v12 }
 0x165   :  { %v112_v13 = vpop.xlane.xlu0 %111 }
 0x166   :  { %v113_v14 = vmul.f32 0.0078125, %v112_v13 }
 0x168   :  { %v114_v15 = vadd.f32 1e-05, %v113_v14 }
 0x16a   :  { %224 = vrsqrt.f32 %v114_v15 }
 0x174   :  { %v225_v16 = vpop.eup %224 }
 0x175   :  { %v116_v18 = vmul.f32 %v225_v16, %v109_v11 }
 0x177   :  { %v122_v20 = vmul.f32 %v201_v17, %v116_v18 }
 0x179   :  { %v128_v21 = vadd.f32 %v202_v19, %v122_v20 }
 0x17b   :  { %129 = vst [vmem:[#allocation8] sm:$0xff] %v128_v21 }
 0x17c   :  { %269 = shalt.err (!%p266_p3)
}
 0x17d   :  { %s270_s6 = scalar_lea.hbm %s381_s3, 128 }
 0x17e   :  { %p271_p4 = scmp.ne.s32.totalorder %s381_s3, %s270_s6  ;;  %p274_p5 = scmp.lt.u32.totalorder %s270_s6, %s381_s3 }
 0x180   :  { %p276_p6 = pnand %p274_p5, %p271_p4 }
 0x182   :  { %279 = shalt.err (!%p276_p6)
}
 0x183   :  { %139 = dma.vmem_to_hbm [thread:$0]  %s137_s30, 128, %s381_s3, [#allocation5]  }
 0x184   :  { %284 = dma.done.wait [#allocation5], 128  }
 0x185   :  { %285 = vsyncadd [#allocation5], 4294967168 }
 0x186   :  { %143 = vsyncpa [#allocation4], 1 }
 0x187   :  { %144 = vsyncpa [#allocation5], 1 }
 0x188   :  { %145 = vsyncpa [#allocation6], 1 }

</bundles_post_ra>
